<compile_context>
chip_gen: v7x
topology: tpu7x:2x2x1
jax: 0.10.0
libtpu: 0.0.40
codegen_flags: <defaults>
</compile_context>

<pallas_src>
import jax
import jax.numpy as jnp
from jax.experimental import pallas as pl
from jax.experimental.pallas import tpu as pltpu


_DMA_WINDOW = 8  # power of two; max in-flight row DMAs on the gather path


# ----------------------------------------------------------------------------
# Kernels
# ----------------------------------------------------------------------------
def _gather_resident_kernel(idx_ref, table_ref, out_ref):
    """Table fully resident in VMEM; gather via one-hot MXU matmul.

    idx_ref:   (B, 1) int32 in VMEM (class ids, already dropout'd & clamped).
    table_ref: (n_classes, embed_dim) in VMEM (whole table, one DMA).
    out_ref:   (B, embed_dim) in VMEM (dense output slab).
    """
    b = out_ref.shape[0]
    n_classes = table_ref.shape[0]
    # One-hot selection matrix: exact gather since each row has exactly one 1.
    iota = jax.lax.broadcasted_iota(jnp.int32, (b, n_classes), 1)
    onehot = (iota == idx_ref[...]).astype(table_ref.dtype)
    out_ref[...] = jnp.dot(
        onehot, table_ref[...], preferred_element_type=jnp.float32
    ).astype(out_ref.dtype)


def _gather_dma_kernel(idx_ref, table_hbm_ref, out_ref, copy_sems):
    """Table stays in HBM; B row DMAs straight into the output block.

    idx_ref:       (B,) int32 in SMEM (class ids).
    table_hbm_ref: (n_classes, embed_dim) raw HBM ref (memory_space=pl.ANY).
    out_ref:       (B, embed_dim) in VMEM (DMA destination == output block).
    copy_sems:     (_DMA_WINDOW,) DMA semaphore ring (bounds in-flight DMAs).
    """
    n_rows = out_ref.shape[0]           # B (static)
    window = copy_sems.shape[0]         # power of two (static)

    def row_copy(i):
        return pltpu.make_async_copy(
            table_hbm_ref.at[pl.ds(idx_ref[i], 1), :],
            out_ref.at[pl.ds(i, 1), :],
            copy_sems.at[i & (window - 1)],
        )

    # Prime: issue up to `window` row DMAs.
    # TODO(synk): de-duplicate repeated ids (e.g. the UCG uncond class) to
    # avoid redundant HBM fetches for very large batches.
    def prime(i, carry):
        row_copy(i).start()
        return carry

    jax.lax.fori_loop(0, min(window, n_rows), prime, 0, unroll=True)

    # Steady state: wait row i, then issue row i + window (bounded window).
    def step(i, carry):
        row_copy(i).wait()

        @pl.when(i + window < n_rows)
        def _():
            row_copy(i + window).start()

        return carry

    jax.lax.fori_loop(0, n_rows, step, 0, unroll=(n_rows <= 32))


# ----------------------------------------------------------------------------
# Wrapper
# ----------------------------------------------------------------------------
def _vmem_capacity_bytes():
    try:
        info = pltpu.get_tpu_info()
        cap = getattr(info, "vmem_capacity_bytes", None)
        if cap:
            return int(cap)
    except Exception:
        pass
    return 64 << 20  # conservative (v7x per-TensorCore VMEM)


def class_embedder_forward(class_ids, embedding_table, *,
                           ucg_rate=0.1, disable_dropout=False,
                           dropout_key=None, gather_mode="auto"):
    """JAX/Pallas equivalent of ClassEmbedder.forward.

    class_ids:        (B,) integer class labels (batch[key]).
    embedding_table:  (n_classes, embed_dim) nn.Embedding weight.
    gather_mode:      "auto" | "resident" | "dma".
    returns:          (B, 1, embed_dim), matching the PyTorch output.
    """
    n_classes, embed_dim = embedding_table.shape
    (B,) = class_ids.shape
    dtype = embedding_table.dtype
    itemsize = jnp.dtype(dtype).itemsize

    # --- UCG dropout on the class ids (integer domain, plain JAX) ----------
    idx = class_ids.astype(jnp.int32)
    if ucg_rate > 0.0 and not disable_dropout:
        if dropout_key is None:
            raise ValueError(
                "dropout_key is required when ucg_rate > 0 and dropout is on")
        drop = jax.random.bernoulli(dropout_key, p=ucg_rate, shape=(B,))
        # Integer-domain equivalent of mask*c + (1-mask)*(n_classes-1); .long()
        idx = jnp.where(drop, jnp.int32(n_classes - 1), idx)
    # Clamp so an out-of-range id can never address out of bounds in-kernel.
    idx = jnp.clip(idx, 0, n_classes - 1)

    table_bytes = int(n_classes * embed_dim * itemsize)
    out_bytes = int(B * embed_dim * itemsize)
    idx_bytes = int(B * 4)

    vmem_cap = _vmem_capacity_bytes()
    vmem_budget = (vmem_cap * 3) // 4
    resident_need = table_bytes + out_bytes + idx_bytes + (1 << 20)

    if gather_mode == "resident":
        use_resident = True
    elif gather_mode == "dma":
        use_resident = False
    else:
        # Auto: resident only when streaming the table costs no more HBM
        # traffic than the row gather (within 2x) AND it fits VMEM once
        # (grid-less call => single-buffered, no pipelining x2).
        use_resident = (table_bytes <= 2 * out_bytes
                        and resident_need <= vmem_budget)

    if use_resident:
        vmem_limit = int(min(vmem_budget,
                             max(resident_need + (2 << 20), 16 << 20)))
        out = pl.pallas_call(
            _gather_resident_kernel,
            out_shape=jax.ShapeDtypeStruct((B, embed_dim), dtype),
            in_specs=[
                pl.BlockSpec(memory_space=pltpu.MemorySpace.VMEM),  # idx (B,1)
                pl.BlockSpec(memory_space=pltpu.MemorySpace.VMEM),  # table
            ],
            out_specs=pl.BlockSpec(memory_space=pltpu.MemorySpace.VMEM),
            compiler_params=pltpu.CompilerParams(vmem_limit_bytes=vmem_limit),
            cost_estimate=pl.CostEstimate(
                flops=2 * B * n_classes * embed_dim,
                transcendentals=0,
                bytes_accessed=table_bytes + out_bytes + idx_bytes),
        )(idx[:, None], embedding_table)
    else:
        out = pl.pallas_call(
            _gather_dma_kernel,
            out_shape=jax.ShapeDtypeStruct((B, embed_dim), dtype),
            in_specs=[
                pl.BlockSpec(memory_space=pltpu.MemorySpace.SMEM),  # idx (B,)
                pl.BlockSpec(memory_space=pl.ANY),                  # table HBM
            ],
            out_specs=pl.BlockSpec(memory_space=pltpu.MemorySpace.VMEM),
            scratch_shapes=[pltpu.SemaphoreType.DMA((_DMA_WINDOW,))],
            cost_estimate=pl.CostEstimate(
                flops=0,
                transcendentals=0,
                bytes_accessed=2 * out_bytes + idx_bytes),
        )(idx, embedding_table)

    # Dense (B, E) slab from the kernel; add the size-1 axis in the wrapper
    # so in-kernel stores stay lane/sublane dense.
    return out[:, None, :]


def get_unconditional_conditioning(bs, n_classes, key="class"):
    uc_class = n_classes - 1
    return {key: jnp.full((bs,), uc_class, dtype=jnp.int32)}


# ----------------------------------------------------------------------------
# Self-test
# ----------------------------------------------------------------------------
if __name__ == "__main__":
    n_classes = 16
    embed_dim = 128

    root = jax.random.PRNGKey(0)
    k_emb, k_ids, k_drop = jax.random.split(root, 3)

    embedding_table = jax.random.normal(k_emb, (n_classes, embed_dim),
                                        dtype=jnp.float32)

    # batch=4 (small) and batch=16 (> DMA window, exercises the issue-ahead
    # ring and repeated class ids).
    for batch in (4, 16):
        class_ids = jax.random.randint(k_ids, (batch,), 0, n_classes,
                                       dtype=jnp.int32)
        ref = embedding_table[class_ids][:, None, :]

        # 1) Training-mode forward (UCG dropout active), default auto path.
        out = class_embedder_forward(class_ids, embedding_table,
                                     ucg_rate=0.1, disable_dropout=False,
                                     dropout_key=k_drop)
        out = jax.block_until_ready(out)
        assert out.shape == (batch, 1, embed_dim)
        # Every output row must be either the sample's row or the uncond row.
        row_is_id = jnp.all(
            jnp.isclose(out[:, 0, :], embedding_table[class_ids]), axis=-1)
        row_is_uc = jnp.all(
            jnp.isclose(out[:, 0, :],
                        embedding_table[n_classes - 1][None, :]), axis=-1)
        assert bool(jnp.all(row_is_id | row_is_uc))

        # 2) Deterministic (dropout disabled), HBM row-DMA gather path.
        out_dma = class_embedder_forward(class_ids, embedding_table,
                                         ucg_rate=0.1, disable_dropout=True,
                                         gather_mode="dma")
        out_dma = jax.block_until_ready(out_dma)
        assert jnp.allclose(out_dma, ref)

        # 3) Table-resident one-hot-matmul path.
        out_res = class_embedder_forward(class_ids, embedding_table,
                                         ucg_rate=0.1, disable_dropout=True,
                                         gather_mode="resident")
        out_res = jax.block_until_ready(out_res)
        assert jnp.allclose(out_res, ref)

    # 4) Unconditional conditioning helper.
    uc = get_unconditional_conditioning(4, n_classes)
    out_uc = class_embedder_forward(uc["class"], embedding_table,
                                    ucg_rate=0.1, disable_dropout=True)
    out_uc = jax.block_until_ready(out_uc)
    assert jnp.allclose(
        out_uc[:, 0, :],
        jnp.broadcast_to(embedding_table[n_classes - 1], (4, embed_dim)))

    print("KERNEL_OK")
</pallas_src>

<mosaic_0001>
module attributes {stable_mosaic.version = 11 : i64} {
  func.func @_gather_dma_kernel(%arg0: memref<4xi32, #tpu.memory_space<smem>>, %arg1: memref<16x128xf32, #tpu.memory_space<any>>, %arg2: memref<4x128xf32, #tpu.memory_space<vmem>>, %arg3: memref<8x!tpu.dma_semaphore, #tpu.memory_space<semaphore_mem>>) attributes {dimension_semantics = [], scalar_prefetch = 0 : i64, scratch_operands = 1 : i64, tpu.core_type = #tpu.core_type<tc>} {
    %c0_i32 = arith.constant 0 : i32
    %0 = arith.index_cast %c0_i32 : i32 to index
    %1 = memref.load %arg0[%0] : memref<4xi32, #tpu.memory_space<smem>>
    %c7_i32 = arith.constant 7 : i32
    %2 = arith.andi %c0_i32, %c7_i32 : i32
    %c0_i32_0 = arith.constant 0 : i32
    %3 = tpu.memref_slice %arg1[%1, %c0_i32_0] : memref<16x128xf32, #tpu.memory_space<any>> -> memref<1x128xf32, #tpu.memory_space<any>>
    %c0_i32_1 = arith.constant 0 : i32
    %4 = tpu.memref_slice %arg2[%c0_i32, %c0_i32_1] : memref<4x128xf32, #tpu.memory_space<vmem>> -> memref<1x128xf32, #tpu.memory_space<vmem>>
    %5 = tpu.memref_slice %arg3[%2] : memref<8x!tpu.dma_semaphore, #tpu.memory_space<semaphore_mem>> -> memref<1x!tpu.dma_semaphore, #tpu.memory_space<semaphore_mem>>
    %6 = tpu.memref_squeeze %5 : memref<1x!tpu.dma_semaphore, #tpu.memory_space<semaphore_mem>> -> memref<!tpu.dma_semaphore, #tpu.memory_space<semaphore_mem>>
    tpu.enqueue_dma source(%3 : memref<1x128xf32, #tpu.memory_space<any>>) target(%4 : memref<1x128xf32, #tpu.memory_space<vmem>>) target_semaphore(%6 : memref<!tpu.dma_semaphore, #tpu.memory_space<semaphore_mem>>)
    %c1_i32 = arith.constant 1 : i32
    %7 = arith.index_cast %c1_i32 : i32 to index
    %8 = memref.load %arg0[%7] : memref<4xi32, #tpu.memory_space<smem>>
    %c7_i32_2 = arith.constant 7 : i32
    %9 = arith.andi %c1_i32, %c7_i32_2 : i32
    %c0_i32_3 = arith.constant 0 : i32
    %10 = tpu.memref_slice %arg1[%8, %c0_i32_3] : memref<16x128xf32, #tpu.memory_space<any>> -> memref<1x128xf32, #tpu.memory_space<any>>
    %c0_i32_4 = arith.constant 0 : i32
    %11 = tpu.memref_slice %arg2[%c1_i32, %c0_i32_4] : memref<4x128xf32, #tpu.memory_space<vmem>> -> memref<1x128xf32, #tpu.memory_space<vmem>>
    %12 = tpu.memref_slice %arg3[%9] : memref<8x!tpu.dma_semaphore, #tpu.memory_space<semaphore_mem>> -> memref<1x!tpu.dma_semaphore, #tpu.memory_space<semaphore_mem>>
    %13 = tpu.memref_squeeze %12 : memref<1x!tpu.dma_semaphore, #tpu.memory_space<semaphore_mem>> -> memref<!tpu.dma_semaphore, #tpu.memory_space<semaphore_mem>>
    tpu.enqueue_dma source(%10 : memref<1x128xf32, #tpu.memory_space<any>>) target(%11 : memref<1x128xf32, #tpu.memory_space<vmem>>) target_semaphore(%13 : memref<!tpu.dma_semaphore, #tpu.memory_space<semaphore_mem>>)
    %c2_i32 = arith.constant 2 : i32
    %14 = arith.index_cast %c2_i32 : i32 to index
    %15 = memref.load %arg0[%14] : memref<4xi32, #tpu.memory_space<smem>>
    %c7_i32_5 = arith.constant 7 : i32
    %16 = arith.andi %c2_i32, %c7_i32_5 : i32
    %c0_i32_6 = arith.constant 0 : i32
    %17 = tpu.memref_slice %arg1[%15, %c0_i32_6] : memref<16x128xf32, #tpu.memory_space<any>> -> memref<1x128xf32, #tpu.memory_space<any>>
    %c0_i32_7 = arith.constant 0 : i32
    %18 = tpu.memref_slice %arg2[%c2_i32, %c0_i32_7] : memref<4x128xf32, #tpu.memory_space<vmem>> -> memref<1x128xf32, #tpu.memory_space<vmem>>
    %19 = tpu.memref_slice %arg3[%16] : memref<8x!tpu.dma_semaphore, #tpu.memory_space<semaphore_mem>> -> memref<1x!tpu.dma_semaphore, #tpu.memory_space<semaphore_mem>>
    %20 = tpu.memref_squeeze %19 : memref<1x!tpu.dma_semaphore, #tpu.memory_space<semaphore_mem>> -> memref<!tpu.dma_semaphore, #tpu.memory_space<semaphore_mem>>
    tpu.enqueue_dma source(%17 : memref<1x128xf32, #tpu.memory_space<any>>) target(%18 : memref<1x128xf32, #tpu.memory_space<vmem>>) target_semaphore(%20 : memref<!tpu.dma_semaphore, #tpu.memory_space<semaphore_mem>>)
    %c3_i32 = arith.constant 3 : i32
    %21 = arith.index_cast %c3_i32 : i32 to index
    %22 = memref.load %arg0[%21] : memref<4xi32, #tpu.memory_space<smem>>
    %c7_i32_8 = arith.constant 7 : i32
    %23 = arith.andi %c3_i32, %c7_i32_8 : i32
    %c0_i32_9 = arith.constant 0 : i32
    %24 = tpu.memref_slice %arg1[%22, %c0_i32_9] : memref<16x128xf32, #tpu.memory_space<any>> -> memref<1x128xf32, #tpu.memory_space<any>>
    %c0_i32_10 = arith.constant 0 : i32
    %25 = tpu.memref_slice %arg2[%c3_i32, %c0_i32_10] : memref<4x128xf32, #tpu.memory_space<vmem>> -> memref<1x128xf32, #tpu.memory_space<vmem>>
    %26 = tpu.memref_slice %arg3[%23] : memref<8x!tpu.dma_semaphore, #tpu.memory_space<semaphore_mem>> -> memref<1x!tpu.dma_semaphore, #tpu.memory_space<semaphore_mem>>
    %27 = tpu.memref_squeeze %26 : memref<1x!tpu.dma_semaphore, #tpu.memory_space<semaphore_mem>> -> memref<!tpu.dma_semaphore, #tpu.memory_space<semaphore_mem>>
    tpu.enqueue_dma source(%24 : memref<1x128xf32, #tpu.memory_space<any>>) target(%25 : memref<1x128xf32, #tpu.memory_space<vmem>>) target_semaphore(%27 : memref<!tpu.dma_semaphore, #tpu.memory_space<semaphore_mem>>)
    %c4_i32 = arith.constant 4 : i32
    %c0_i32_11 = arith.constant 0 : i32
    %28 = arith.index_cast %c0_i32_11 : i32 to index
    %29 = memref.load %arg0[%28] : memref<4xi32, #tpu.memory_space<smem>>
    %c7_i32_12 = arith.constant 7 : i32
    %30 = arith.andi %c0_i32_11, %c7_i32_12 : i32
    %c0_i32_13 = arith.constant 0 : i32
    %31 = tpu.memref_slice %arg1[%29, %c0_i32_13] : memref<16x128xf32, #tpu.memory_space<any>> -> memref<1x128xf32, #tpu.memory_space<any>>
    %c0_i32_14 = arith.constant 0 : i32
    %32 = tpu.memref_slice %arg2[%c0_i32_11, %c0_i32_14] : memref<4x128xf32, #tpu.memory_space<vmem>> -> memref<1x128xf32, #tpu.memory_space<vmem>>
    %33 = tpu.memref_slice %arg3[%30] : memref<8x!tpu.dma_semaphore, #tpu.memory_space<semaphore_mem>> -> memref<1x!tpu.dma_semaphore, #tpu.memory_space<semaphore_mem>>
    %34 = tpu.memref_squeeze %33 : memref<1x!tpu.dma_semaphore, #tpu.memory_space<semaphore_mem>> -> memref<!tpu.dma_semaphore, #tpu.memory_space<semaphore_mem>>
    tpu.wait_dma2 semaphore(%34 : memref<!tpu.dma_semaphore, #tpu.memory_space<semaphore_mem>>) src(%31 : memref<1x128xf32, #tpu.memory_space<any>>) dst(%32 : memref<1x128xf32, #tpu.memory_space<vmem>>)
    %c8_i32 = arith.constant 8 : i32
    %35 = arith.addi %c0_i32_11, %c8_i32 : i32
    %c4_i32_15 = arith.constant 4 : i32
    %36 = arith.cmpi slt, %35, %c4_i32_15 : i32
    %37 = arith.extui %36 : i1 to i32
    %c0_i32_16 = arith.constant 0 : i32
    %38 = arith.cmpi ne, %37, %c0_i32_16 : i32
    scf.if %38 {
      %c8_i32_39 = arith.constant 8 : i32
      %72 = arith.addi %c0_i32_11, %c8_i32_39 : i32
      %73 = arith.index_cast %72 : i32 to index
      %74 = memref.load %arg0[%73] : memref<4xi32, #tpu.memory_space<smem>>
      %c7_i32_40 = arith.constant 7 : i32
      %75 = arith.andi %72, %c7_i32_40 : i32
      %c0_i32_41 = arith.constant 0 : i32
      %76 = tpu.memref_slice %arg1[%74, %c0_i32_41] : memref<16x128xf32, #tpu.memory_space<any>> -> memref<1x128xf32, #tpu.memory_space<any>>
      %c0_i32_42 = arith.constant 0 : i32
      %77 = tpu.memref_slice %arg2[%72, %c0_i32_42] : memref<4x128xf32, #tpu.memory_space<vmem>> -> memref<1x128xf32, #tpu.memory_space<vmem>>
      %78 = tpu.memref_slice %arg3[%75] : memref<8x!tpu.dma_semaphore, #tpu.memory_space<semaphore_mem>> -> memref<1x!tpu.dma_semaphore, #tpu.memory_space<semaphore_mem>>
      %79 = tpu.memref_squeeze %78 : memref<1x!tpu.dma_semaphore, #tpu.memory_space<semaphore_mem>> -> memref<!tpu.dma_semaphore, #tpu.memory_space<semaphore_mem>>
      tpu.enqueue_dma source(%76 : memref<1x128xf32, #tpu.memory_space<any>>) target(%77 : memref<1x128xf32, #tpu.memory_space<vmem>>) target_semaphore(%79 : memref<!tpu.dma_semaphore, #tpu.memory_space<semaphore_mem>>)
    } else {
    }
    %c1_i32_17 = arith.constant 1 : i32
    %39 = arith.index_cast %c1_i32_17 : i32 to index
    %40 = memref.load %arg0[%39] : memref<4xi32, #tpu.memory_space<smem>>
    %c7_i32_18 = arith.constant 7 : i32
    %41 = arith.andi %c1_i32_17, %c7_i32_18 : i32
    %c0_i32_19 = arith.constant 0 : i32
    %42 = tpu.memref_slice %arg1[%40, %c0_i32_19] : memref<16x128xf32, #tpu.memory_space<any>> -> memref<1x128xf32, #tpu.memory_space<any>>
    %c0_i32_20 = arith.constant 0 : i32
    %43 = tpu.memref_slice %arg2[%c1_i32_17, %c0_i32_20] : memref<4x128xf32, #tpu.memory_space<vmem>> -> memref<1x128xf32, #tpu.memory_space<vmem>>
    %44 = tpu.memref_slice %arg3[%41] : memref<8x!tpu.dma_semaphore, #tpu.memory_space<semaphore_mem>> -> memref<1x!tpu.dma_semaphore, #tpu.memory_space<semaphore_mem>>
    %45 = tpu.memref_squeeze %44 : memref<1x!tpu.dma_semaphore, #tpu.memory_space<semaphore_mem>> -> memref<!tpu.dma_semaphore, #tpu.memory_space<semaphore_mem>>
    tpu.wait_dma2 semaphore(%45 : memref<!tpu.dma_semaphore, #tpu.memory_space<semaphore_mem>>) src(%42 : memref<1x128xf32, #tpu.memory_space<any>>) dst(%43 : memref<1x128xf32, #tpu.memory_space<vmem>>)
    %c8_i32_21 = arith.constant 8 : i32
    %46 = arith.addi %c1_i32_17, %c8_i32_21 : i32
    %c4_i32_22 = arith.constant 4 : i32
    %47 = arith.cmpi slt, %46, %c4_i32_22 : i32
    %48 = arith.extui %47 : i1 to i32
    %c0_i32_23 = arith.constant 0 : i32
    %49 = arith.cmpi ne, %48, %c0_i32_23 : i32
    scf.if %49 {
      %c8_i32_39 = arith.constant 8 : i32
      %72 = arith.addi %c1_i32_17, %c8_i32_39 : i32
      %73 = arith.index_cast %72 : i32 to index
      %74 = memref.load %arg0[%73] : memref<4xi32, #tpu.memory_space<smem>>
      %c7_i32_40 = arith.constant 7 : i32
      %75 = arith.andi %72, %c7_i32_40 : i32
      %c0_i32_41 = arith.constant 0 : i32
      %76 = tpu.memref_slice %arg1[%74, %c0_i32_41] : memref<16x128xf32, #tpu.memory_space<any>> -> memref<1x128xf32, #tpu.memory_space<any>>
      %c0_i32_42 = arith.constant 0 : i32
      %77 = tpu.memref_slice %arg2[%72, %c0_i32_42] : memref<4x128xf32, #tpu.memory_space<vmem>> -> memref<1x128xf32, #tpu.memory_space<vmem>>
      %78 = tpu.memref_slice %arg3[%75] : memref<8x!tpu.dma_semaphore, #tpu.memory_space<semaphore_mem>> -> memref<1x!tpu.dma_semaphore, #tpu.memory_space<semaphore_mem>>
      %79 = tpu.memref_squeeze %78 : memref<1x!tpu.dma_semaphore, #tpu.memory_space<semaphore_mem>> -> memref<!tpu.dma_semaphore, #tpu.memory_space<semaphore_mem>>
      tpu.enqueue_dma source(%76 : memref<1x128xf32, #tpu.memory_space<any>>) target(%77 : memref<1x128xf32, #tpu.memory_space<vmem>>) target_semaphore(%79 : memref<!tpu.dma_semaphore, #tpu.memory_space<semaphore_mem>>)
    } else {
    }
    %c2_i32_24 = arith.constant 2 : i32
    %50 = arith.index_cast %c2_i32_24 : i32 to index
    %51 = memref.load %arg0[%50] : memref<4xi32, #tpu.memory_space<smem>>
    %c7_i32_25 = arith.constant 7 : i32
    %52 = arith.andi %c2_i32_24, %c7_i32_25 : i32
    %c0_i32_26 = arith.constant 0 : i32
    %53 = tpu.memref_slice %arg1[%51, %c0_i32_26] : memref<16x128xf32, #tpu.memory_space<any>> -> memref<1x128xf32, #tpu.memory_space<any>>
    %c0_i32_27 = arith.constant 0 : i32
    %54 = tpu.memref_slice %arg2[%c2_i32_24, %c0_i32_27] : memref<4x128xf32, #tpu.memory_space<vmem>> -> memref<1x128xf32, #tpu.memory_space<vmem>>
    %55 = tpu.memref_slice %arg3[%52] : memref<8x!tpu.dma_semaphore, #tpu.memory_space<semaphore_mem>> -> memref<1x!tpu.dma_semaphore, #tpu.memory_space<semaphore_mem>>
    %56 = tpu.memref_squeeze %55 : memref<1x!tpu.dma_semaphore, #tpu.memory_space<semaphore_mem>> -> memref<!tpu.dma_semaphore, #tpu.memory_space<semaphore_mem>>
    tpu.wait_dma2 semaphore(%56 : memref<!tpu.dma_semaphore, #tpu.memory_space<semaphore_mem>>) src(%53 : memref<1x128xf32, #tpu.memory_space<any>>) dst(%54 : memref<1x128xf32, #tpu.memory_space<vmem>>)
    %c8_i32_28 = arith.constant 8 : i32
    %57 = arith.addi %c2_i32_24, %c8_i32_28 : i32
    %c4_i32_29 = arith.constant 4 : i32
    %58 = arith.cmpi slt, %57, %c4_i32_29 : i32
    %59 = arith.extui %58 : i1 to i32
    %c0_i32_30 = arith.constant 0 : i32
    %60 = arith.cmpi ne, %59, %c0_i32_30 : i32
    scf.if %60 {
      %c8_i32_39 = arith.constant 8 : i32
      %72 = arith.addi %c2_i32_24, %c8_i32_39 : i32
      %73 = arith.index_cast %72 : i32 to index
      %74 = memref.load %arg0[%73] : memref<4xi32, #tpu.memory_space<smem>>
      %c7_i32_40 = arith.constant 7 : i32
      %75 = arith.andi %72, %c7_i32_40 : i32
      %c0_i32_41 = arith.constant 0 : i32
      %76 = tpu.memref_slice %arg1[%74, %c0_i32_41] : memref<16x128xf32, #tpu.memory_space<any>> -> memref<1x128xf32, #tpu.memory_space<any>>
      %c0_i32_42 = arith.constant 0 : i32
      %77 = tpu.memref_slice %arg2[%72, %c0_i32_42] : memref<4x128xf32, #tpu.memory_space<vmem>> -> memref<1x128xf32, #tpu.memory_space<vmem>>
      %78 = tpu.memref_slice %arg3[%75] : memref<8x!tpu.dma_semaphore, #tpu.memory_space<semaphore_mem>> -> memref<1x!tpu.dma_semaphore, #tpu.memory_space<semaphore_mem>>
      %79 = tpu.memref_squeeze %78 : memref<1x!tpu.dma_semaphore, #tpu.memory_space<semaphore_mem>> -> memref<!tpu.dma_semaphore, #tpu.memory_space<semaphore_mem>>
      tpu.enqueue_dma source(%76 : memref<1x128xf32, #tpu.memory_space<any>>) target(%77 : memref<1x128xf32, #tpu.memory_space<vmem>>) target_semaphore(%79 : memref<!tpu.dma_semaphore, #tpu.memory_space<semaphore_mem>>)
    } else {
    }
    %c3_i32_31 = arith.constant 3 : i32
    %61 = arith.index_cast %c3_i32_31 : i32 to index
    %62 = memref.load %arg0[%61] : memref<4xi32, #tpu.memory_space<smem>>
    %c7_i32_32 = arith.constant 7 : i32
    %63 = arith.andi %c3_i32_31, %c7_i32_32 : i32
    %c0_i32_33 = arith.constant 0 : i32
    %64 = tpu.memref_slice %arg1[%62, %c0_i32_33] : memref<16x128xf32, #tpu.memory_space<any>> -> memref<1x128xf32, #tpu.memory_space<any>>
    %c0_i32_34 = arith.constant 0 : i32
    %65 = tpu.memref_slice %arg2[%c3_i32_31, %c0_i32_34] : memref<4x128xf32, #tpu.memory_space<vmem>> -> memref<1x128xf32, #tpu.memory_space<vmem>>
    %66 = tpu.memref_slice %arg3[%63] : memref<8x!tpu.dma_semaphore, #tpu.memory_space<semaphore_mem>> -> memref<1x!tpu.dma_semaphore, #tpu.memory_space<semaphore_mem>>
    %67 = tpu.memref_squeeze %66 : memref<1x!tpu.dma_semaphore, #tpu.memory_space<semaphore_mem>> -> memref<!tpu.dma_semaphore, #tpu.memory_space<semaphore_mem>>
    tpu.wait_dma2 semaphore(%67 : memref<!tpu.dma_semaphore, #tpu.memory_space<semaphore_mem>>) src(%64 : memref<1x128xf32, #tpu.memory_space<any>>) dst(%65 : memref<1x128xf32, #tpu.memory_space<vmem>>)
    %c8_i32_35 = arith.constant 8 : i32
    %68 = arith.addi %c3_i32_31, %c8_i32_35 : i32
    %c4_i32_36 = arith.constant 4 : i32
    %69 = arith.cmpi slt, %68, %c4_i32_36 : i32
    %70 = arith.extui %69 : i1 to i32
    %c0_i32_37 = arith.constant 0 : i32
    %71 = arith.cmpi ne, %70, %c0_i32_37 : i32
    scf.if %71 {
      %c8_i32_39 = arith.constant 8 : i32
      %72 = arith.addi %c3_i32_31, %c8_i32_39 : i32
      %73 = arith.index_cast %72 : i32 to index
      %74 = memref.load %arg0[%73] : memref<4xi32, #tpu.memory_space<smem>>
      %c7_i32_40 = arith.constant 7 : i32
      %75 = arith.andi %72, %c7_i32_40 : i32
      %c0_i32_41 = arith.constant 0 : i32
      %76 = tpu.memref_slice %arg1[%74, %c0_i32_41] : memref<16x128xf32, #tpu.memory_space<any>> -> memref<1x128xf32, #tpu.memory_space<any>>
      %c0_i32_42 = arith.constant 0 : i32
      %77 = tpu.memref_slice %arg2[%72, %c0_i32_42] : memref<4x128xf32, #tpu.memory_space<vmem>> -> memref<1x128xf32, #tpu.memory_space<vmem>>
      %78 = tpu.memref_slice %arg3[%75] : memref<8x!tpu.dma_semaphore, #tpu.memory_space<semaphore_mem>> -> memref<1x!tpu.dma_semaphore, #tpu.memory_space<semaphore_mem>>
      %79 = tpu.memref_squeeze %78 : memref<1x!tpu.dma_semaphore, #tpu.memory_space<semaphore_mem>> -> memref<!tpu.dma_semaphore, #tpu.memory_space<semaphore_mem>>
      tpu.enqueue_dma source(%76 : memref<1x128xf32, #tpu.memory_space<any>>) target(%77 : memref<1x128xf32, #tpu.memory_space<vmem>>) target_semaphore(%79 : memref<!tpu.dma_semaphore, #tpu.memory_space<semaphore_mem>>)
    } else {
    }
    %c4_i32_38 = arith.constant 4 : i32
    return
  }
}

</mosaic_0001>

<bundles_post_ra>
// kernel: tpu_custom_call.1
= control target key start
LH: loop header
LB: loop body
LE: loop exit
PB: predicated region body
PF: predicated region fallthrough
CT: control target
= control target key end

     0   :  { %7 = vsyncpa [#allocation5], 0  ;;  %s460_s0 = inlined_call_operand.hbm [shape: s32[4], index: 0, kind: input, shape index: {}]   ;;  %s461_s1 = inlined_call_operand.hbm [shape: f32[16,128], index: 1, kind: input, shape index: {}]   ;;  %s462_s2 = inlined_call_operand.hbm [shape: f32[4,128], index: 2, kind: output, shape index: {}]  }
   0x1   :  { %8 = vsyncpa [#allocation4], 0  ;;  %s194_s11 = scalar_lea.hbm %s460_s0, 16 }
   0x2   :  { %p195_p0 = scmp.ne.s32.totalorder %s460_s0, %s194_s11  ;;  %p198_p1 = scmp.lt.u32.totalorder %s194_s11, %s460_s0 }
   0x4   :  { %p200_p2 = pnand %p198_p1, %p195_p0 }
   0x6   :  { %203 = shalt.err (!%p200_p2)
}
   0x7   :  { %s334_s16 = smov [#allocation3]  }
   0x8   :  { %16 = dma.hbm_to_smem %s460_s0, 16, %s334_s16, [#allocation5]  }
   0x9   :  { %322 = dma.done.wait [#allocation5], 16  }
   0xa   :  { %323 = vsyncadd [#allocation5], 4294967280 }
   0xb   :  { %20 = sfence }
   0xc   :  { %s21_s19 = sld [smem:[#allocation3]]  ;;  %s335_s20 = smov [#allocation6]  }
   0xd   :  { %s31_s21 = sshll.u32 %s335_s20, 4  ;;  %s366_s22 = sld [smem:[#allocation3 + $0x1]]  ;;  %s368_s21 = int_to_ptr.vmem [resolvable:$true] %s31_s21 }
   0xe   :  { %s336_s23 = smov [#allocation6 + $0x1]   ;;  %s370_s25 = sld [smem:[#allocation3 + $0x2]] }
   0xf   :  { %s47_s24 = sshll.u32 %s336_s23, 4  ;;  %s337_s26 = smov [#allocation6 + $0x2]   ;;  %s372_s24 = int_to_ptr.vmem [resolvable:$true] %s47_s24 }
  0x10   :  { %s63_s27 = sshll.u32 %s337_s26, 4  ;;  %s374_s0 = sld [smem:[#allocation3 + $0x3]]  ;;  %s376_s27 = int_to_ptr.vmem [resolvable:$true] %s63_s27 }
  0x11   :  { %s385_s8 = scalar_lea.hbm %s461_s1, 256 }
  0x12   :  { %s174_s28 = sshll.u32 %s21_s19, 4 }
  0x13   :  { %s23_s3 = scalar_lea.hbm %s461_s1, %s174_s28  ;;  %s176_s4 = sshll.u32 %s366_s22, 4 }
  0x14   :  { %s204_s5 = scalar_lea.hbm %s23_s3, 16  ;;  %p207_p4 = scmp.lt.u32.totalorder %s23_s3, %s461_s1 }
  0x15   :  { %p205_p3 = scmp.ne.s32.totalorder %s23_s3, %s204_s5  ;;  %p208_p5 = scmp.lt.u32.totalorder %s385_s8, %s204_s5 }
  0x16   :  { %p210_p7 = scmp.lt.u32.totalorder %s204_s5, %s23_s3 }
  0x17   :  { %p209_p6 = por %p208_p5, %p207_p4 }
  0x19   :  { %p211_p8 = por %p210_p7, %p209_p6 }
  0x1b   :  { %p212_p9 = pnand %p211_p8, %p205_p3 }
  0x1d   :  { %215 = shalt.err (!%p212_p9)  }
  0x1e   :  { %s216_s11 = scalar_lea.vmem %s368_s21, 16  ;;  %s394_s12 = scalar_lea.vmem %s368_s21, 64 }
  0x1f   :  { %p217_p10 = scmp.ne.s32.totalorder %s368_s21, %s216_s11  ;;  %p221_p11 = scmp.lt.s32.totalorder %s368_s21, %s368_s21 }
  0x20   :  { %p222_p12 = scmp.lt.s32.totalorder %s394_s12, %s216_s11 }
  0x22   :  { %p223_p13 = por %p222_p12, %p221_p11 }
  0x24   :  { %p224_p0 = pnand %p223_p13, %p217_p10 }
  0x26   :  { %227 = shalt.err (!%p224_p0)  }
  0x27   :  { %34 = dma.hbm_to_vmem [thread:$0]  %s23_s3, 16, %s368_s21, [#allocation2] }
  0x28   :  { %s37_s15 = scalar_lea.hbm %s461_s1, %s176_s4  ;;  %s178_s16 = sshll.u32 %s370_s25, 4 }
  0x29   :  { %s228_s17 = scalar_lea.hbm %s37_s15, 16  ;;  %p231_p2 = scmp.lt.u32.totalorder %s37_s15, %s461_s1 }
  0x2a   :  { %p229_p1 = scmp.ne.s32.totalorder %s37_s15, %s228_s17  ;;  %p232_p3 = scmp.lt.u32.totalorder %s385_s8, %s228_s17 }
  0x2b   :  { %p234_p5 = scmp.lt.u32.totalorder %s228_s17, %s37_s15 }
  0x2c   :  { %p233_p4 = por %p232_p3, %p231_p2 }
  0x2e   :  { %p235_p6 = por %p234_p5, %p233_p4 }
  0x30   :  { %p236_p7 = pnand %p235_p6, %p229_p1 }
  0x32   :  { %239 = shalt.err (!%p236_p7)  }
  0x33   :  { %s240_s20 = scalar_lea.vmem %s372_s24, 16  ;;  %p245_p9 = scmp.lt.s32.totalorder %s372_s24, %s368_s21 }
  0x34   :  { %p241_p8 = scmp.ne.s32.totalorder %s372_s24, %s240_s20  ;;  %p246_p10 = scmp.lt.s32.totalorder %s394_s12, %s240_s20 }
  0x36   :  { %p247_p12 = por %p246_p10, %p245_p9 }
  0x38   :  { %p248_p13 = pnand %p247_p12, %p241_p8 }
  0x3a   :  { %251 = shalt.err (!%p248_p13)  }
  0x3b   :  { %50 = dma.hbm_to_vmem [thread:$0]  %s37_s15, 16, %s372_s24, [#allocation2 + $0x1] }
  0x3c   :  { %s53_s25 = scalar_lea.hbm %s461_s1, %s178_s16  ;;  %s180_s26 = sshll.u32 %s374_s0, 4 }
  0x3d   :  { %s252_s28 = scalar_lea.hbm %s53_s25, 16  ;;  %p255_p1 = scmp.lt.u32.totalorder %s53_s25, %s461_s1 }
  0x3e   :  { %p253_p0 = scmp.ne.s32.totalorder %s53_s25, %s252_s28  ;;  %p256_p2 = scmp.lt.u32.totalorder %s385_s8, %s252_s28 }
  0x3f   :  { %p258_p4 = scmp.lt.u32.totalorder %s252_s28, %s53_s25 }
  0x40   :  { %p257_p3 = por %p256_p2, %p255_p1 }
  0x42   :  { %p259_p5 = por %p258_p4, %p257_p3 }
  0x44   :  { %p260_p6 = pnand %p259_p5, %p253_p0 }
  0x46   :  { %263 = shalt.err (!%p260_p6)  }
  0x47   :  { %s264_s24 = scalar_lea.vmem %s376_s27, 16  ;;  %p269_p8 = scmp.lt.s32.totalorder %s376_s27, %s368_s21 }
  0x48   :  { %p265_p7 = scmp.ne.s32.totalorder %s376_s27, %s264_s24  ;;  %p270_p9 = scmp.lt.s32.totalorder %s394_s12, %s264_s24 }
  0x4a   :  { %p271_p10 = por %p270_p9, %p269_p8 }
  0x4c   :  { %p272_p12 = pnand %p271_p10, %p265_p7 }
  0x4e   :  { %275 = shalt.err (!%p272_p12)  }
  0x4f   :  { %66 = dma.hbm_to_vmem [thread:$0]  %s53_s25, 16, %s376_s27, [#allocation2 + $0x2] }
  0x50   :  { %s69_s4 = scalar_lea.hbm %s461_s1, %s180_s26  ;;  %s338_s5 = smov [#allocation6 + $0x3]  }
  0x51   :  { %s79_s6 = sshll.u32 %s338_s5, 4  ;;  %s276_s7 = scalar_lea.hbm %s69_s4, 16  ;;  %s80_s6 = int_to_ptr.vmem [resolvable:$true] %s79_s6 }
  0x52   :  { %p277_p13 = scmp.ne.s32.totalorder %s69_s4, %s276_s7  ;;  %p279_p0 = scmp.lt.u32.totalorder %s69_s4, %s461_s1 }
  0x53   :  { %p280_p1 = scmp.lt.u32.totalorder %s385_s8, %s276_s7  ;;  %p282_p3 = scmp.lt.u32.totalorder %s276_s7, %s69_s4 }
  0x55   :  { %p281_p2 = por %p280_p1, %p279_p0 }
  0x57   :  { %p283_p4 = por %p282_p3, %p281_p2 }
  0x59   :  { %p284_p5 = pnand %p283_p4, %p277_p13 }
  0x5b   :  { %287 = shalt.err (!%p284_p5)  }
  0x5c   :  { %s288_s27 = scalar_lea.vmem %s80_s6, 16  ;;  %p293_p7 = scmp.lt.s32.totalorder %s80_s6, %s368_s21 }
  0x5d   :  { %p289_p6 = scmp.ne.s32.totalorder %s80_s6, %s288_s27  ;;  %p294_p8 = scmp.lt.s32.totalorder %s394_s12, %s288_s27 }
  0x5f   :  { %p295_p9 = por %p294_p8, %p293_p7 }
  0x61   :  { %p296_p10 = pnand %p295_p9, %p289_p6 }
  0x63   :  { %299 = shalt.err (!%p296_p10)  }
  0x64   :  { %82 = dma.hbm_to_vmem [thread:$0]  %s69_s4, 16, %s80_s6, [#allocation2 + $0x3] }
  0x65   :  { %324 = dma.done.wait [#allocation2], 16 }
  0x66   :  { %325 = vsyncadd [#allocation2], 4294967280 }
  0x67   :  { %326 = dma.done.wait [#allocation2 + $0x1], 16 }
  0x68   :  { %327 = vsyncadd [#allocation2 + $0x1], 4294967280 }
  0x69   :  { %328 = dma.done.wait [#allocation2 + $0x2], 16 }
  0x6a   :  { %329 = vsyncadd [#allocation2 + $0x2], 4294967280 }
  0x6b   :  { %330 = dma.done.wait [#allocation2 + $0x3], 16 }
  0x6c   :  { %331 = vsyncadd [#allocation2 + $0x3], 4294967280  ;;  %p301_p12 = scmp.ne.s32.totalorder %s368_s21, %s394_s12  ;;  %p306_p13 = scmp.lt.s32.totalorder %s394_s12, %s394_s12 }
  0x6e   :  { %p307_p0 = por %p306_p13, %p221_p11 }
  0x70   :  { %p308_p1 = pnand %p307_p0, %p301_p12 }
  0x72   :  { %311 = shalt.err (!%p308_p1)
}
  0x73   :  { %s312_s11 = scalar_lea.hbm %s462_s2, 64 }
  0x74   :  { %p313_p2 = scmp.ne.s32.totalorder %s462_s2, %s312_s11  ;;  %p316_p3 = scmp.lt.u32.totalorder %s312_s11, %s462_s2 }
  0x76   :  { %p318_p4 = pnand %p316_p3, %p313_p2 }
  0x78   :  { %321 = shalt.err (!%p318_p4)
}
  0x79   :  { %105 = dma.vmem_to_hbm [thread:$0]  %s368_s21, 64, %s462_s2, [#allocation4]  }
  0x7a   :  { %332 = dma.done.wait [#allocation4], 64  }
  0x7b   :  { %333 = vsyncadd [#allocation4], 4294967232 }
  0x7c   :  { %109 = vsyncpa [#allocation4], 1 }
  0x7d   :  { %110 = vsyncpa [#allocation5], 1 }
  0x7e   :  { %111 = vsyncmov [#allocation2] }
  0x81   :  { %s112_s18 = vpop.sfrf %111 }
  0x82   :  { %p181_p11 = scmp.ne.s32.totalorder %s112_s18, 0 }
  0x84   :  { %116 = shalt.err (%p181_p11)  }
  0x85   :  { %118 = vsyncmov [#allocation2 + $0x1] }
  0x88   :  { %s119_s19 = vpop.sfrf %118 }
  0x89   :  { %p182_p5 = scmp.ne.s32.totalorder %s119_s19, 0 }
  0x8b   :  { %123 = shalt.err (%p182_p5)  }
  0x8c   :  { %125 = vsyncmov [#allocation2 + $0x2] }
  0x8f   :  { %s126_s20 = vpop.sfrf %125 }
  0x90   :  { %p183_p6 = scmp.ne.s32.totalorder %s126_s20, 0 }
  0x92   :  { %130 = shalt.err (%p183_p6)  }
  0x93   :  { %132 = vsyncmov [#allocation2 + $0x3] }
  0x96   :  { %s133_s22 = vpop.sfrf %132 }
  0x97   :  { %p184_p7 = scmp.ne.s32.totalorder %s133_s22, 0 }
  0x99   :  { %137 = shalt.err (%p184_p7)  }
  0x9a   :  { %139 = vsyncmov [#allocation2 + $0x4] }
  0x9d   :  { %s140_s2 = vpop.sfrf %139 }
  0x9e   :  { %p185_p8 = scmp.ne.s32.totalorder %s140_s2, 0 }
  0xa0   :  { %144 = shalt.err (%p185_p8)  }
  0xa1   :  { %146 = vsyncmov [#allocation2 + $0x5] }
  0xa4   :  { %s147_s21 = vpop.sfrf %146 }
  0xa5   :  { %p186_p9 = scmp.ne.s32.totalorder %s147_s21, 0 }
  0xa7   :  { %151 = shalt.err (%p186_p9)  }
  0xa8   :  { %153 = vsyncmov [#allocation2 + $0x6] }
  0xab   :  { %s154_s23 = vpop.sfrf %153 }
  0xac   :  { %p187_p10 = scmp.ne.s32.totalorder %s154_s23, 0 }
  0xae   :  { %158 = shalt.err (%p187_p10)  }
  0xaf   :  { %160 = vsyncmov [#allocation2 + $0x7] }
  0xb2   :  { %s161_s25 = vpop.sfrf %160 }
  0xb3   :  { %p188_p12 = scmp.ne.s32.totalorder %s161_s25, 0 }
  0xb5   :  { %165 = shalt.err (%p188_p12)  }

</bundles_post_ra>
